<compile_context>
chip_gen: v7x
topology: tpu7x:2x2x1
jax: 0.10.0
libtpu: 0.0.40
codegen_flags: <defaults>
</compile_context>

<pallas_src>
import functools

import jax
import jax.numpy as jnp
import numpy as np
from jax.experimental import pallas as pl
from jax.experimental.pallas import tpu as pltpu


_TARGET_BLOCK_BYTES = 4 * 1024 * 1024  # ~4 MiB/block: long DMA bursts, few
                                        # grid steps, 4x double-buffered stays
                                        # under every chip's scoped VMEM.


def _choose_tiles(B, F, T, itemsize, target_bytes=_TARGET_BLOCK_BYTES):
    """Pick (b_tile, t_tile) for the (b_tile, F, t_tile) block."""
    slab = F * T * itemsize                      # one batch's full-T slab
    if slab <= target_bytes:
        t_tile = T                               # full-T block: one long DMA run
    else:
        # Largest 128-multiple divisor of T with F*t_tile*itemsize <= target
        # (divisor of T -> no ragged last tile -> unmasked lane-dense stores).
        max_t = max(128, (target_bytes // (F * itemsize)) // 128 * 128)
        t_tile = None
        for cand in range(min((T // 128) * 128, max_t), 0, -128):
            if T % cand == 0:
                t_tile = cand
                break
        if t_tile is None:
            t_tile = min(T, max_t)               # ragged last tile, still correct
    # Fold batches so tiny per-batch slabs don't each pay a grid step.
    per_b = F * t_tile * itemsize
    b_tile = max(1, min(B, target_bytes // max(1, per_b)))
    # Keep >= 2 steps on a parallel axis so both v7x TensorCores get work.
    if b_tile >= B and t_tile >= T:
        if B >= 2:
            b_tile = (B + 1) // 2
        elif T % 256 == 0:
            t_tile = T // 2
        # else: single-step grid (B == 1, tiny T) -- nothing useful to split.
    return b_tile, t_tile


def _spec_augment_kernel(tstart_ref, tend_ref, fstart_ref, fend_ref,
                         x_ref, o_ref, *, num_time_masks, num_freq_masks,
                         mask_value, batch_size):
    # x_ref / o_ref: (B_TILE, F, T_TILE) block for (batch-tile bi, time-tile tj).
    # tstart/tend/fstart/fend: full (B, num_masks) int32 arrays in SMEM
    # (scalar prefetch), indexed per folded batch.
    bi = pl.program_id(0)
    tj = pl.program_id(1)
    B_TILE, F, T_TILE = x_ref.shape

    # Separable 1-D index vectors (2-D shapes: sublane x lane, no useless
    # leading dim in the final broadcast OR / select lowering).
    t_idx = jax.lax.broadcasted_iota(jnp.int32, (1, T_TILE), 1) + tj * T_TILE
    f_idx = jax.lax.broadcasted_iota(jnp.int32, (F, 1), 0)

    fill = jnp.asarray(mask_value, x_ref.dtype)   # hoisted splat

    # Static unroll over the folded batches; each sub-batch builds two tiny
    # 1-D masks from SMEM scalars and does one broadcast OR + one select over
    # its (F, T_TILE) slab.
    for sub in range(B_TILE):
        # Clamp covers padded rows of a ragged last batch block (their writes
        # are dropped by the pipeline); it only keeps the SMEM read in bounds.
        b = jnp.minimum(bi * B_TILE + sub, batch_size - 1)

        t_mask = jnp.zeros((1, T_TILE), dtype=jnp.bool_)
        for m in range(num_time_masks):           # static unroll, tiny vectors
            s = tstart_ref[b, m]
            e = tend_ref[b, m]
            t_mask = t_mask | ((t_idx >= s) & (t_idx < e))

        f_mask = jnp.zeros((F, 1), dtype=jnp.bool_)
        for m in range(num_freq_masks):
            s = fstart_ref[b, m]
            e = fend_ref[b, m]
            f_mask = f_mask | ((f_idx >= s) & (f_idx < e))

        o_ref[sub] = jnp.where(t_mask | f_mask, fill, x_ref[sub])


def spec_augment_pallas(input_spec, t_start, t_end, f_start, f_end,
                        mask_value=0.0):
    """Apply SpecAugment masks.  input_spec: (B, F, T) float."""
    B, F, T = input_spec.shape
    num_time_masks = t_start.shape[1]
    num_freq_masks = f_start.shape[1]
    itemsize = jnp.dtype(input_spec.dtype).itemsize

    b_tile, t_tile = _choose_tiles(B, F, T, itemsize)
    nb = pl.cdiv(B, b_tile)
    nt = pl.cdiv(T, t_tile)
    block_bytes = b_tile * F * t_tile * itemsize
    # in + out, double-buffered each, plus compiler scratch headroom; capped
    # well under v7x's 64 MiB physical VMEM.
    vmem_limit = int(min(64 << 20, max(16 << 20, 4 * block_bytes + (4 << 20))))

    kernel = functools.partial(
        _spec_augment_kernel,
        num_time_masks=num_time_masks,
        num_freq_masks=num_freq_masks,
        mask_value=mask_value,
        batch_size=B,
    )

    # NB: if the spectrogram is ever bf16 (worth ~2x on this mem-bound op),
    # the full-F block used here keeps the packed (16,128) layout legal.
    grid_spec = pltpu.PrefetchScalarGridSpec(
        num_scalar_prefetch=4,
        grid=(nb, nt),
        in_specs=[pl.BlockSpec((b_tile, F, t_tile),
                               lambda bi, tj, *_: (bi, 0, tj))],
        out_specs=pl.BlockSpec((b_tile, F, t_tile),
                               lambda bi, tj, *_: (bi, 0, tj)),
    )

    cost = pl.CostEstimate(
        flops=B * F * T,                              # one compare/select/elt
        transcendentals=0,
        bytes_accessed=2 * B * F * T * itemsize,      # read + write, HBM-bound
    )

    return pl.pallas_call(
        kernel,
        out_shape=jax.ShapeDtypeStruct(input_spec.shape, input_spec.dtype),
        grid_spec=grid_spec,
        compiler_params=pltpu.CompilerParams(
            dimension_semantics=("parallel", "parallel"),
            vmem_limit_bytes=vmem_limit),
        cost_estimate=cost,
        # In-place update of the spectrogram: input index 4 (the 4 scalar
        # prefetch operands come first) aliases output 0.  Pair with buffer
        # donation at the jit boundary so no defensive copy is inserted.
        input_output_aliases={4: 0},
    )(t_start.astype(jnp.int32), t_end.astype(jnp.int32),
      f_start.astype(jnp.int32), f_end.astype(jnp.int32), input_spec)


def make_mask_params(key, length, *, num_freq_bins, freq_masks, time_masks,
                     freq_width, time_width):
    """Glue reproducing the reference RNG math (torch.rand * width -> .long()).

    Mirrors the module's vectorized path (including no clamping of mask_start,
    which the vectorized PyTorch path also omits).
    """
    B = length.shape[0]
    k_tw, k_ts, k_fw, k_fs = jax.random.split(key, 4)

    # Time-axis masks (integer time_width path).
    # TODO(synk): adaptive float time_width path not exercised here; it only
    # changes the per-batch `width` (clamp(time_width * length, max=T)) used
    # when drawing mask widths in this glue.
    tw = (jax.random.uniform(k_tw, (B, time_masks), dtype=jnp.float32)
          * time_width).astype(jnp.int32)
    ts = (jax.random.uniform(k_ts, (B, time_masks), dtype=jnp.float32)
          * (length[:, None].astype(jnp.float32) - tw.astype(jnp.float32))
          ).astype(jnp.int32)
    te = ts + tw

    # Frequency-axis masks.
    fw = (jax.random.uniform(k_fw, (B, freq_masks), dtype=jnp.float32)
          * freq_width).astype(jnp.int32)
    fs = (jax.random.uniform(k_fs, (B, freq_masks), dtype=jnp.float32)
          * (num_freq_bins - fw.astype(jnp.float32))).astype(jnp.int32)
    fe = fs + fw

    return ts, te, fs, fe


def reference_jax(input_spec, t_start, t_end, f_start, f_end, mask_value=0.0):
    """Plain-JAX reference mirroring the PyTorch vectorized forward."""
    B, F, T = input_spec.shape
    t_idx = jnp.arange(T)
    time_mask = ((t_idx[None, None, :] >= t_start[:, :, None])
                 & (t_idx[None, None, :] < t_end[:, :, None])).any(axis=1)
    f_idx = jnp.arange(F)
    freq_mask = ((f_idx[None, None, :] >= f_start[:, :, None])
                 & (f_idx[None, None, :] < f_end[:, :, None])).any(axis=1)
    mask = time_mask[:, None, :] | freq_mask[:, :, None]
    return jnp.where(mask, jnp.asarray(mask_value, input_spec.dtype),
                     input_spec)


if __name__ == "__main__":
    # SpecAugment config (synthetic, deterministic).
    freq_masks = 2
    time_masks = 2
    freq_width = 4
    time_width = 20       # integer time_width (non-adaptive path)
    mask_value = 0.0

    # Lane-dense test shape: T a multiple of 128; tile chooser folds batches
    # into a (2, F, T) block and keeps a 2-step parallel grid.
    B, F, T = 4, 16, 1024
    key = jax.random.PRNGKey(0)
    k_spec, k_masks = jax.random.split(key)

    input_spec = jax.random.normal(k_spec, (B, F, T), dtype=jnp.float32)
    length = jnp.array([T, 800, 640, 512], dtype=jnp.int32)

    t_start, t_end, f_start, f_end = make_mask_params(
        k_masks, length,
        num_freq_bins=F, freq_masks=freq_masks, time_masks=time_masks,
        freq_width=freq_width, time_width=time_width)

    # Compute the reference first (the kernel aliases / donates its input).
    ref = reference_jax(input_spec, t_start, t_end, f_start, f_end, mask_value)
    ref = jax.block_until_ready(ref)

    # Donate the spectrogram so the in-place alias is real (2 full-tensor HBM
    # passes instead of 3 on this purely bandwidth-bound op).
    run = jax.jit(functools.partial(spec_augment_pallas, mask_value=mask_value),
                  donate_argnums=(0,))
    out = run(input_spec, t_start, t_end, f_start, f_end)
    out = jax.block_until_ready(out)

    np.testing.assert_allclose(np.asarray(out), np.asarray(ref),
                               rtol=0.0, atol=0.0)

    print("KERNEL_OK")
</pallas_src>

<mosaic_0001>
module attributes {stable_mosaic.version = 11 : i64} {
  func.func @_spec_augment_kernel(%arg0: i32, %arg1: i32, %arg2: memref<4x2xi32, #tpu.memory_space<smem>>, %arg3: memref<4x2xi32, #tpu.memory_space<smem>>, %arg4: memref<4x2xi32, #tpu.memory_space<smem>>, %arg5: memref<4x2xi32, #tpu.memory_space<smem>>, %arg6: memref<2x16x1024xf32, #tpu.memory_space<vmem>>, %arg7: memref<2x16x1024xf32, #tpu.memory_space<vmem>>) attributes {dimension_semantics = [#tpu.dimension_semantics<parallel>, #tpu.dimension_semantics<parallel>], iteration_bounds = array<i64: 2, 1>, scalar_prefetch = 4 : i64, scratch_operands = 0 : i64, tpu.core_type = #tpu.core_type<tc>, window_params = [{transform_indices = @transform_0, window_bounds = array<i64: 2, 16, 1024>}, {transform_indices = @transform_1, window_bounds = array<i64: 2, 16, 1024>}]} {
    %0 = tpu.iota {dimensions = array<i32: 1>} : vector<1x1024xi32>
    %c1024_i32 = arith.constant 1024 : i32
    %1 = arith.muli %arg1, %c1024_i32 : i32
    %2 = vector.broadcast %1 : i32 to vector<1x1024xi32>
    %3 = arith.addi %0, %2 : vector<1x1024xi32>
    %4 = tpu.iota {dimensions = array<i32: 0>} : vector<16x1xi32>
    %c2_i32 = arith.constant 2 : i32
    %5 = arith.muli %arg0, %c2_i32 : i32
    %c0_i32 = arith.constant 0 : i32
    %6 = arith.addi %5, %c0_i32 : i32
    %c3_i32 = arith.constant 3 : i32
    %7 = arith.minsi %6, %c3_i32 : i32
    %false = arith.constant false
    %8 = vector.broadcast %false : i1 to vector<1x1024xi1>
    %9 = arith.index_cast %7 : i32 to index
    %c0 = arith.constant 0 : index
    %10 = memref.load %arg2[%9, %c0] : memref<4x2xi32, #tpu.memory_space<smem>>
    %11 = arith.index_cast %7 : i32 to index
    %c0_0 = arith.constant 0 : index
    %12 = memref.load %arg3[%11, %c0_0] : memref<4x2xi32, #tpu.memory_space<smem>>
    %13 = vector.broadcast %10 : i32 to vector<1x1024xi32>
    %14 = arith.cmpi sge, %3, %13 : vector<1x1024xi32>
    %15 = vector.broadcast %12 : i32 to vector<1x1024xi32>
    %16 = arith.cmpi slt, %3, %15 : vector<1x1024xi32>
    %17 = arith.andi %14, %16 : vector<1x1024xi1>
    %18 = arith.ori %8, %17 : vector<1x1024xi1>
    %19 = arith.index_cast %7 : i32 to index
    %c1 = arith.constant 1 : index
    %20 = memref.load %arg2[%19, %c1] : memref<4x2xi32, #tpu.memory_space<smem>>
    %21 = arith.index_cast %7 : i32 to index
    %c1_1 = arith.constant 1 : index
    %22 = memref.load %arg3[%21, %c1_1] : memref<4x2xi32, #tpu.memory_space<smem>>
    %23 = vector.broadcast %20 : i32 to vector<1x1024xi32>
    %24 = arith.cmpi sge, %3, %23 : vector<1x1024xi32>
    %25 = vector.broadcast %22 : i32 to vector<1x1024xi32>
    %26 = arith.cmpi slt, %3, %25 : vector<1x1024xi32>
    %27 = arith.andi %24, %26 : vector<1x1024xi1>
    %28 = arith.ori %18, %27 : vector<1x1024xi1>
    %false_2 = arith.constant false
    %29 = vector.broadcast %false_2 : i1 to vector<16x1xi1>
    %30 = arith.index_cast %7 : i32 to index
    %c0_3 = arith.constant 0 : index
    %31 = memref.load %arg4[%30, %c0_3] : memref<4x2xi32, #tpu.memory_space<smem>>
    %32 = arith.index_cast %7 : i32 to index
    %c0_4 = arith.constant 0 : index
    %33 = memref.load %arg5[%32, %c0_4] : memref<4x2xi32, #tpu.memory_space<smem>>
    %34 = vector.broadcast %31 : i32 to vector<16x1xi32>
    %35 = arith.cmpi sge, %4, %34 : vector<16x1xi32>
    %36 = vector.broadcast %33 : i32 to vector<16x1xi32>
    %37 = arith.cmpi slt, %4, %36 : vector<16x1xi32>
    %38 = arith.andi %35, %37 : vector<16x1xi1>
    %39 = arith.ori %29, %38 : vector<16x1xi1>
    %40 = arith.index_cast %7 : i32 to index
    %c1_5 = arith.constant 1 : index
    %41 = memref.load %arg4[%40, %c1_5] : memref<4x2xi32, #tpu.memory_space<smem>>
    %42 = arith.index_cast %7 : i32 to index
    %c1_6 = arith.constant 1 : index
    %43 = memref.load %arg5[%42, %c1_6] : memref<4x2xi32, #tpu.memory_space<smem>>
    %44 = vector.broadcast %41 : i32 to vector<16x1xi32>
    %45 = arith.cmpi sge, %4, %44 : vector<16x1xi32>
    %46 = vector.broadcast %43 : i32 to vector<16x1xi32>
    %47 = arith.cmpi slt, %4, %46 : vector<16x1xi32>
    %48 = arith.andi %45, %47 : vector<16x1xi1>
    %49 = arith.ori %39, %48 : vector<16x1xi1>
    %50 = vector.broadcast %28 : vector<1x1024xi1> to vector<16x1024xi1>
    %51 = vector.broadcast %49 : vector<16x1xi1> to vector<16x1024xi1>
    %52 = arith.ori %50, %51 : vector<16x1024xi1>
    %c0_7 = arith.constant 0 : index
    %c0_8 = arith.constant 0 : index
    %c0_9 = arith.constant 0 : index
    %53 = vector.load %arg6[%c0_7, %c0_8, %c0_9] : memref<2x16x1024xf32, #tpu.memory_space<vmem>>, vector<1x16x1024xf32>
    %54 = vector.shape_cast %53 : vector<1x16x1024xf32> to vector<16x1024xf32>
    %cst = arith.constant 0.000000e+00 : f32
    %55 = vector.broadcast %cst : f32 to vector<16x1024xf32>
    %56 = arith.select %52, %55, %54 : vector<16x1024xi1>, vector<16x1024xf32>
    %c0_10 = arith.constant 0 : index
    %c0_11 = arith.constant 0 : index
    %c0_12 = arith.constant 0 : index
    %57 = vector.load %arg7[%c0_10, %c0_11, %c0_12] : memref<2x16x1024xf32, #tpu.memory_space<vmem>>, vector<1x16x1024xf32>
    %58 = vector.shape_cast %57 : vector<1x16x1024xf32> to vector<16x1024xf32>
    %59 = vector.shape_cast %56 : vector<16x1024xf32> to vector<1x16x1024xf32>
    tpu.vector_store %arg7[%c0_10, %c0_11, %c0_12], %59 {strides = array<i32>} : memref<2x16x1024xf32, #tpu.memory_space<vmem>>, vector<1x16x1024xf32>,
    %c2_i32_13 = arith.constant 2 : i32
    %60 = arith.muli %arg0, %c2_i32_13 : i32
    %c1_i32 = arith.constant 1 : i32
    %61 = arith.addi %60, %c1_i32 : i32
    %c3_i32_14 = arith.constant 3 : i32
    %62 = arith.minsi %61, %c3_i32_14 : i32
    %false_15 = arith.constant false
    %63 = vector.broadcast %false_15 : i1 to vector<1x1024xi1>
    %64 = arith.index_cast %62 : i32 to index
    %c0_16 = arith.constant 0 : index
    %65 = memref.load %arg2[%64, %c0_16] : memref<4x2xi32, #tpu.memory_space<smem>>
    %66 = arith.index_cast %62 : i32 to index
    %c0_17 = arith.constant 0 : index
    %67 = memref.load %arg3[%66, %c0_17] : memref<4x2xi32, #tpu.memory_space<smem>>
    %68 = vector.broadcast %65 : i32 to vector<1x1024xi32>
    %69 = arith.cmpi sge, %3, %68 : vector<1x1024xi32>
    %70 = vector.broadcast %67 : i32 to vector<1x1024xi32>
    %71 = arith.cmpi slt, %3, %70 : vector<1x1024xi32>
    %72 = arith.andi %69, %71 : vector<1x1024xi1>
    %73 = arith.ori %63, %72 : vector<1x1024xi1>
    %74 = arith.index_cast %62 : i32 to index
    %c1_18 = arith.constant 1 : index
    %75 = memref.load %arg2[%74, %c1_18] : memref<4x2xi32, #tpu.memory_space<smem>>
    %76 = arith.index_cast %62 : i32 to index
    %c1_19 = arith.constant 1 : index
    %77 = memref.load %arg3[%76, %c1_19] : memref<4x2xi32, #tpu.memory_space<smem>>
    %78 = vector.broadcast %75 : i32 to vector<1x1024xi32>
    %79 = arith.cmpi sge, %3, %78 : vector<1x1024xi32>
    %80 = vector.broadcast %77 : i32 to vector<1x1024xi32>
    %81 = arith.cmpi slt, %3, %80 : vector<1x1024xi32>
    %82 = arith.andi %79, %81 : vector<1x1024xi1>
    %83 = arith.ori %73, %82 : vector<1x1024xi1>
    %false_20 = arith.constant false
    %84 = vector.broadcast %false_20 : i1 to vector<16x1xi1>
    %85 = arith.index_cast %62 : i32 to index
    %c0_21 = arith.constant 0 : index
    %86 = memref.load %arg4[%85, %c0_21] : memref<4x2xi32, #tpu.memory_space<smem>>
    %87 = arith.index_cast %62 : i32 to index
    %c0_22 = arith.constant 0 : index
    %88 = memref.load %arg5[%87, %c0_22] : memref<4x2xi32, #tpu.memory_space<smem>>
    %89 = vector.broadcast %86 : i32 to vector<16x1xi32>
    %90 = arith.cmpi sge, %4, %89 : vector<16x1xi32>
    %91 = vector.broadcast %88 : i32 to vector<16x1xi32>
    %92 = arith.cmpi slt, %4, %91 : vector<16x1xi32>
    %93 = arith.andi %90, %92 : vector<16x1xi1>
    %94 = arith.ori %84, %93 : vector<16x1xi1>
    %95 = arith.index_cast %62 : i32 to index
    %c1_23 = arith.constant 1 : index
    %96 = memref.load %arg4[%95, %c1_23] : memref<4x2xi32, #tpu.memory_space<smem>>
    %97 = arith.index_cast %62 : i32 to index
    %c1_24 = arith.constant 1 : index
    %98 = memref.load %arg5[%97, %c1_24] : memref<4x2xi32, #tpu.memory_space<smem>>
    %99 = vector.broadcast %96 : i32 to vector<16x1xi32>
    %100 = arith.cmpi sge, %4, %99 : vector<16x1xi32>
    %101 = vector.broadcast %98 : i32 to vector<16x1xi32>
    %102 = arith.cmpi slt, %4, %101 : vector<16x1xi32>
    %103 = arith.andi %100, %102 : vector<16x1xi1>
    %104 = arith.ori %94, %103 : vector<16x1xi1>
    %105 = vector.broadcast %83 : vector<1x1024xi1> to vector<16x1024xi1>
    %106 = vector.broadcast %104 : vector<16x1xi1> to vector<16x1024xi1>
    %107 = arith.ori %105, %106 : vector<16x1024xi1>
    %c1_25 = arith.constant 1 : index
    %c0_26 = arith.constant 0 : index
    %c0_27 = arith.constant 0 : index
    %108 = vector.load %arg6[%c1_25, %c0_26, %c0_27] : memref<2x16x1024xf32, #tpu.memory_space<vmem>>, vector<1x16x1024xf32>
    %109 = vector.shape_cast %108 : vector<1x16x1024xf32> to vector<16x1024xf32>
    %cst_28 = arith.constant 0.000000e+00 : f32
    %110 = vector.broadcast %cst_28 : f32 to vector<16x1024xf32>
    %111 = arith.select %107, %110, %109 : vector<16x1024xi1>, vector<16x1024xf32>
    %c1_29 = arith.constant 1 : index
    %c0_30 = arith.constant 0 : index
    %c0_31 = arith.constant 0 : index
    %112 = vector.load %arg7[%c1_29, %c0_30, %c0_31] : memref<2x16x1024xf32, #tpu.memory_space<vmem>>, vector<1x16x1024xf32>
    %113 = vector.shape_cast %112 : vector<1x16x1024xf32> to vector<16x1024xf32>
    %114 = vector.shape_cast %111 : vector<16x1024xf32> to vector<1x16x1024xf32>
    tpu.vector_store %arg7[%c1_29, %c0_30, %c0_31], %114 {strides = array<i32>} : memref<2x16x1024xf32, #tpu.memory_space<vmem>>, vector<1x16x1024xf32>,
    return
  }
  func.func @transform_0(%arg0: i32, %arg1: i32, %arg2: memref<4x2xi32, #tpu.memory_space<smem>>, %arg3: memref<4x2xi32, #tpu.memory_space<smem>>, %arg4: memref<4x2xi32, #tpu.memory_space<smem>>, %arg5: memref<4x2xi32, #tpu.memory_space<smem>>) -> (i32, i32, i32) {
    %c0_i32 = arith.constant 0 : i32
    %c0_i32_0 = arith.constant 0 : i32
    return %arg0, %c0_i32, %arg1 : i32, i32, i32
  }
  func.func @transform_1(%arg0: i32, %arg1: i32, %arg2: memref<4x2xi32, #tpu.memory_space<smem>>, %arg3: memref<4x2xi32, #tpu.memory_space<smem>>, %arg4: memref<4x2xi32, #tpu.memory_space<smem>>, %arg5: memref<4x2xi32, #tpu.memory_space<smem>>) -> (i32, i32, i32) {
    %c0_i32 = arith.constant 0 : i32
    %c0_i32_0 = arith.constant 0 : i32
    return %arg0, %c0_i32, %arg1 : i32, i32, i32
  }
}

</mosaic_0001>

<bundles_post_ra>
// kernel: spec_augment_pallas.1
= control target key start
LH: loop header
LB: loop body
LE: loop exit
PB: predicated region body
PF: predicated region fallthrough
CT: control target
= control target key end

     0   :  { %s1964_s0 = inlined_call_operand.vmem [shape: s32[4,2], index: 0, kind: input, shape index: {}]   ;;  %s1965_s4 = inlined_call_operand.hbm [shape: f32[4,16,1024], index: 4, kind: input, shape index: {}, may-alias: {4,5}]   ;;  %s1966_s5 = inlined_call_operand.hbm [shape: f32[4,16,1024], index: 5, kind: output, shape index: {}, may-alias: {4,5}]   ;;  %s1967_s1 = inlined_call_operand.vmem [shape: s32[4,2], index: 1, kind: input, shape index: {}]   ;;  %s1968_s2 = inlined_call_operand.vmem [shape: s32[4,2], index: 2, kind: input, shape index: {}]   ;;  %s1969_s3 = inlined_call_operand.vmem [shape: s32[4,2], index: 3, kind: input, shape index: {}]  }
   0x1   :  { %s10_s20 = sshll.u32 %s1964_s0, 4  ;;  %s14_s23 = sshll.u32 %s1967_s1, 4  ;;  %s11_s20 = int_to_ptr.vmem [resolvable:$true] %s10_s20  ;;  %s15_s23 = int_to_ptr.vmem [resolvable:$true] %s14_s23 }
   0x2   :  { %s784_s24 = scalar_lea.vmem %s11_s20, 64  ;;  %p789_p1 = scmp.lt.s32.totalorder %s11_s20, %s11_s20 }
   0x3   :  { %p785_p0 = scmp.ne.s32.totalorder %s11_s20, %s784_s24  ;;  %p790_p2 = scmp.lt.s32.totalorder %s784_s24, %s784_s24 }
   0x5   :  { %p791_p3 = por %p790_p2, %p789_p1 }
   0x7   :  { %p792_p4 = pnand %p791_p3, %p785_p0 }
   0x9   :  { %795 = shalt.err (!%p792_p4)  }
   0xa   :  { %s948_s25 = smov [#allocation3]   ;;  %s796_s26 = scalar_lea.vmem %s15_s23, 64 }
   0xb   :  { %13 = dma.vmem_to_smem %s11_s20, 64, %s948_s25, [#allocation2] }
   0xc   :  { %p797_p5 = scmp.ne.s32.totalorder %s15_s23, %s796_s26  ;;  %p801_p6 = scmp.lt.s32.totalorder %s15_s23, %s15_s23 }
   0xd   :  { %p802_p7 = scmp.lt.s32.totalorder %s796_s26, %s796_s26 }
   0xf   :  { %p803_p8 = por %p802_p7, %p801_p6 }
  0x11   :  { %p804_p9 = pnand %p803_p8, %p797_p5 }
  0x13   :  { %807 = shalt.err (!%p804_p9)  }
  0x14   :  { %s949_s0 = smov [#allocation4]   ;;  %s18_s28 = sshll.u32 %s1968_s2, 4  ;;  %s19_s28 = int_to_ptr.vmem [resolvable:$true] %s18_s28 }
  0x15   :  { %17 = dma.vmem_to_smem %s15_s23, 64, %s949_s0, [#allocation2] }
  0x16   :  { %s22_s6 = sshll.u32 %s1969_s3, 4  ;;  %s808_s7 = scalar_lea.vmem %s19_s28, 64  ;;  %s23_s6 = int_to_ptr.vmem [resolvable:$true] %s22_s6 }
  0x17   :  { %p809_p10 = scmp.ne.s32.totalorder %s19_s28, %s808_s7  ;;  %p813_p11 = scmp.lt.s32.totalorder %s19_s28, %s19_s28 }
  0x18   :  { %p814_p12 = scmp.lt.s32.totalorder %s808_s7, %s808_s7 }
  0x1a   :  { %p815_p13 = por %p814_p12, %p813_p11 }
  0x1c   :  { %p816_p0 = pnand %p815_p13, %p809_p10 }
  0x1e   :  { %819 = shalt.err (!%p816_p0)  }
  0x1f   :  { %s950_s8 = smov [#allocation5]   ;;  %s820_s9 = scalar_lea.vmem %s23_s6, 64 }
  0x20   :  { %21 = dma.vmem_to_smem %s19_s28, 64, %s950_s8, [#allocation2] }
  0x21   :  { %p821_p1 = scmp.ne.s32.totalorder %s23_s6, %s820_s9  ;;  %p825_p2 = scmp.lt.s32.totalorder %s23_s6, %s23_s6 }
  0x22   :  { %p826_p3 = scmp.lt.s32.totalorder %s820_s9, %s820_s9 }
  0x24   :  { %p827_p4 = por %p826_p3, %p825_p2 }
  0x26   :  { %p828_p5 = pnand %p827_p4, %p821_p1 }
  0x28   :  { %831 = shalt.err (!%p828_p5)  }
  0x29   :  { %s951_s2 = smov [#allocation6]  }
  0x2a   :  { %25 = dma.vmem_to_smem %s23_s6, 64, %s951_s2, [#allocation2] }
  0x2b   :  { %914 = dma.done.wait [#allocation2], 256 }
  0x2c   :  { %915 = vsyncadd [#allocation2], 4294967040 }
  0x2d   :  { %27 = sfence }
  0x2e   :  { %28 = vsyncpa [#allocation8], 0 }
  0x2f   :  { %30 = vsyncpa [#allocation8 + $0x1], 0 }
  0x30   :  { %31 = vsyncpa [#allocation9], 0 }
  0x31   :  { %33 = vsyncpa [#allocation9 + $0x1], 0  ;;  %s1000_s3 = smov 0   ;;  %s1002_s10 = smov 0  }
  0x32   :  { %s1004_s11 = smov 0   ;;  %s1006_s12 = smov 0  }
  0x33   :  { %s1008_s13 = smov 0   ;;  %s1010_s14 = smov 0  }
  0x34 LB: > { %s658_s15 = sadd.s32 4294967295, %s946_s14   ;;  %s659_s16 = sadd.s32 4294967294, %s946_s14   ;;  %s946_s14 = sphi %s1010_s14, %s39_s14   ;;  %s942_s13 = sphi %s1008_s13, %s2128_s13   ;;  %s938_s12 = sphi %s1006_s12, %s2127_s12   ;;  %s934_s11 = sphi %s1004_s11, %s2126_s11   ;;  %s930_s10 = sphi %s1002_s10, %s2125_s10   ;;  %s926_s3 = sphi %s1000_s3, %s2124_s3  }
  0x35   : > { %s51_s17 = sadd.s32 1, %s942_s13  ;;  %s60_s18 = sadd.s32 1, %s934_s11 }
  0x36   : > { %p53_p6 = scmp.ge.s32.totalorder %s51_s17, 2  ;;  %p67_p7 = scmp.ne.s32.totalorder %s934_s11, %s930_s10 }
  0x37   : > { %p68_p8 = scmp.eq.s32.totalorder %s946_s14, 0  ;;  %p73_p9 = scmp.ne.s32.totalorder %s930_s10, %s926_s3 }
  0x38   : > { %s2130_s17 = smov (%p53_p6, %s51_s17), 0  ;;  %p74_p11 = scmp.eq.s32.totalorder %s658_s15, 0 }
  0x39   : > { %p1041_p10 = por %p68_p8, %p67_p7  ;;  %s55_s20 = ssub.s32 %s942_s13, %s2130_s17 }
  0x3a   : > { %p99_p12 = scmp.eq.s32.totalorder %s658_s15, 1  ;;  %p58_p13 = scmp.eq.s32.totalorder %s55_s20, 0 }
  0x3b   : > { %p1047_p0 = por %p74_p11, %p73_p9  ;;  %p105_p2 = scmp.eq.s32.totalorder %s659_s16, 1 }
  0x3c   : > { %p1051_p1 = por %p99_p12, %p67_p7  ;;  %p726_p5 = scmp.lt.s32.totalorder %s946_s14, 2 }
  0x3d   : > { %s1056_s23 = scalar_select %p58_p13, %s934_s11, %s60_s18  }
  0x3e   : > { %s2006_s22 = scalar_select %p1051_p1, 1, 0 }
  0x3f   : > { %p1058_p3 = por %p105_p2, %p73_p9  ;;  %s125_s25 = sand.u32 1, %s934_s11  }
  0x40   : > { %s662_s26 = sshll.u32 %s125_s25, 8  ;;  %s711_s0 = sshll.u32 %s942_s13, 12 }
  0x41   : > { %s2007_s24 = scalar_select %p1058_p3, 1, 0 }
  0x42   : > { %s1069_s28 = scalar_lea.hbm %s1965_s4, %s711_s0  ;;  %s129_s29 = scalar_lea.vmem [#allocation7], %s662_s26 }
  0x43   : > { %s139_s30 = sshll.u32 %s129_s29, 4  ;;  %p1075_p6 = pnand %p726_p5, %p1041_p10  ;;  %s1071_s30 = int_to_ptr.vmem [resolvable:$true] %s139_s30 }
  0x44   : > { %s1080_s7 = scalar_lea.sflag [#allocation8], %s125_s25  ;;  %s832_s8 = scalar_lea.hbm %s1069_s28, 4096 }
  0x45   : > { %p833_p8 = scmp.ne.s32.totalorder %s1069_s28, %s832_s8  ;;  %p834_p9 = pneg %p1075_p6 }
  0x46   : > { %s837_s15 = scalar_lea.hbm %s1965_s4, 8192  ;;  %p838_p10 = scmp.lt.u32.totalorder %s1069_s28, %s1965_s4 }
  0x47   : > { %p835_p11 = pnand %p834_p9, %p833_p8  ;;  %p839_p13 = scmp.lt.u32.totalorder %s837_s15, %s832_s8 }
  0x48   : > { %p841_p5 = scmp.lt.u32.totalorder %s832_s8, %s1069_s28 }
  0x49   : > { %p836_p12 = pneg %p835_p11  ;;  %p840_p2 = por %p839_p13, %p838_p10 }
  0x4b   : > { %p842_p4 = por %p841_p5, %p840_p2 }
  0x4d   : > { %p843_p7 = pnand %p842_p4, %p836_p12 }
  0x4f   : > { %846 = shalt.err (!%p843_p7)
}
  0x50   : > { %s847_s19 = scalar_lea.vmem %s1071_s30, 4096  ;;  %s952_s20 = smov [#allocation7]  }
  0x51   : > { %p848_p8 = scmp.ne.s32.totalorder %s1071_s30, %s847_s19  ;;  %s852_s25 = sshll.u32 %s952_s20, 4  ;;  %s853_s25 = int_to_ptr.vmem [resolvable:$false] %s852_s25 }
  0x52   : > { %s854_s26 = scalar_lea.vmem %s853_s25, 8192  ;;  %p855_p1 = scmp.lt.s32.totalorder %s1071_s30, %s853_s25 }
  0x53   : > { %p850_p11 = pnand %p848_p8, %p834_p9  ;;  %p856_p10 = scmp.lt.s32.totalorder %s854_s26, %s847_s19 }
  0x55   : > { %p851_p3 = pneg %p850_p11  ;;  %p857_p13 = por %p856_p10, %p855_p1 }
  0x57   : > { %p858_p2 = pnand %p857_p13, %p851_p3 }
  0x59   : > { %861 = shalt.err (!%p858_p2)
}
  0x5a   : > { %s953_s0 = smov 1024   ;;  %s954_s1 = smov 64  }
  0x5b   : > { %721 = dma.hbm_to_vmem [thread:$0]  (!%p1075_p6), %s1069_s28, 4096, %s1071_s30, %s1080_s7, %s953_s0, %s953_s0, %s954_s1  }
  0x5c   : > { %p147_p4 = scmp.lt.s32.totalorder %s946_s14, 3  ;;  %p2009_p7 = scmp.ge.s32.totalorder %s946_s14, 1 }
  0x5e   : > { %p148_p9 = pnand %p2009_p7, %p147_p4 }
  0x5f   : > { %s1112_s27 = sand.u32 (!%p148_p9), 1, %s930_s10  }
  0x60   : > { %151 = sbr.rel (%p148_p9) target bundleno = 242 (0xf2), region = 24  ;;  %s667_s29 = sshll.u32 (!%p148_p9), %s1112_s27, 8 }
  0x61   : > { %s154_s8 = scalar_lea.sflag (!%p148_p9), [#allocation8], %s1112_s27  ;;  %s1118_s9 = scalar_lea.vmem (!%p148_p9), [#allocation7], %s667_s29 }
  0x67   : > { %917 = dma.done.wait (%p1047_p0), %s154_s8, 4096  }
  0x68   : > { %919 = vsyncadd (%p1047_p0), %s154_s8, 4294963200  ;;  %s1125_s28 = sshll.u32 %s938_s12, 1  ;;  %v180_v0 = vlaneseq  ;;  %v329_v17 = vld [vmem:[%s1118_s9] sm:$0xff]  ;;  %v330_v21 = vld [vmem:[%s1118_s9 + $0x8] sm:$0xff]  ;;  %s1235_s26 = scalar_lea.vmem [#allocation10], %s667_s29  ;;  %v2022_v24 = vmov 0 }
  0x69   : > { %p203_p1 = scmp.lt.s32.totalorder %s1125_s28, 3  ;;  %v2024_v25 = vmov 0  ;;  %v331_v26 = vld [vmem:[%s1118_s9 + $0x10] sm:$0xff]  ;;  %v2026_v29 = vmov 0  ;;  %s377_s0 = sadd.s32 1, %s1125_s28  ;;  %v2028_v30 = vmov 0 }
  0x6a   : > { %v1129_v1 = vand.u32 127, %v180_v0  ;;  %v1142_v3 = vshrl.u32 %v180_v0, 7  ;;  %v332_v31 = vld [vmem:[%s1118_s9 + $0x18] sm:$0xff]  ;;  %p378_p0 = scmp.lt.s32.totalorder %s377_s0, 3  ;;  %v2032_v35 = vmov 0  ;;  %v333_v36 = vld [vmem:[%s1118_s9 + $0x20] sm:$0xff] }
  0x6b   : > { %s204_s30 = scalar_select %p203_p1, %s1125_s28, 3  ;;  %v2034_v39 = vmov 0  ;;  %v2036_v40 = vmov 0  ;;  %v334_v41 = vld [vmem:[%s1118_s9 + $0x28] sm:$0xff]  ;;  %v2038_v44 = vmov 0  ;;  %v2040_v45 = vmov 0 }
  0x6c   : > { %v1138_v2 = vadd.s32 128, %v1129_v1  ;;  %v1203_v16 = vadd.s32 256, %v1129_v1  ;;  %v1231_v22 = vadd.s32 384, %v1129_v1  ;;  %v1268_v27 = vadd.s32 512, %v1129_v1  ;;  %s2132_s0 = smov (!%p378_p0, %s377_s0), 3  ;;  %v335_v46 = vld [vmem:[%s1118_s9 + $0x30] sm:$0xff] }
  0x6d   : > { %s670_s6 = sshll.u32 %s204_s30, 7  ;;  %v1301_v32 = vadd.s32 640, %v1129_v1  ;;  %v1333_v37 = vadd.s32 768, %v1129_v1  ;;  %v1365_v42 = vadd.s32 896, %v1129_v1  ;;  %s1382_s1 = sshll.u32 %s2132_s0, 7  ;;  %v1399_v47 = vadd.s32 8, %v1142_v3 }
  0x6e   : > { %s206_s7 = sld [smem:[#allocation3 + %s670_s6]]  ;;  %s234_s15 = sadd.s32 1, %s670_s6  ;;  %v336_v51 = vld [vmem:[%s1118_s9 + $0x38] sm:$0xff]  ;;  %v337_v55 = vld [vmem:[%s1118_s9 + $0x40] sm:$0xff]  ;;  %v338_v57 = vld [vmem:[%s1118_s9 + $0x48] sm:$0xff] }
  0x6f   : > { %s207_s2 = sld [smem:[#allocation4 + %s670_s6]]  ;;  %s409_s29 = sadd.s32 1, %s1382_s1  ;;  %v339_v58 = vld [vmem:[%s1118_s9 + $0x50] sm:$0xff]  ;;  %v340_v60 = vld [vmem:[%s1118_s9 + $0x58] sm:$0xff]  ;;  %v341_v0 = vld [vmem:[%s1118_s9 + $0x60] sm:$0xff] }
  0x70   : > { %s1131_s16 = sld [smem:[#allocation5 + %s670_s6]]  ;;  %v680_v50 = vld [vmem:[%s1118_s9 + $0xc0] sm:$0xff]  ;;  %v682_v52 = vld [vmem:[%s1118_s9 + $0xd0] sm:$0xff]  ;;  %p2121_p6 = scmp.ne.s32.totalorder %s2006_s22, 0 }
  0x71   : > { %s235_s18 = sld [smem:[#allocation3 + %s234_s15]]  ;;  %v684_v56 = vld [vmem:[%s1118_s9 + $0xe0] sm:$0xff]  ;;  %s955_s0 = smov [#allocation10]  }
  0x72   : > { %s236_s21 = sld [smem:[#allocation4 + %s234_s15]] }
  0x73   : > { %s1133_s19 = sld [smem:[#allocation6 + %s670_s6]] }
  0x74   : > { %s1135_s20 = sld [smem:[#allocation5 + %s234_s15]]  ;;  %v1144_v4 = vstv %s206_s7 }
  0x75   : > { %s1140_s25 = sld [smem:[#allocation6 + %s234_s15]]  ;;  %v1146_v5 = vstv %s207_s2  ;;  %vm209_vm0 = vcmp.ge.s32.totalorder %v1129_v1, %v1144_v4  ;;  %vm210_vm2 = vcmp.ge.s32.totalorder %v1138_v2, %v1144_v4 }
  0x76   : > { %vm218_vm1 = vcmp.lt.s32.totalorder %v1129_v1, %v1146_v5  ;;  %v273_v6 = vstv %s1131_s16  ;;  %vm219_vm5 = vcmp.lt.s32.totalorder %v1138_v2, %v1146_v5  ;;  %s381_s8 = sld [smem:[#allocation3 + %s1382_s1]] }
  0x77   : > { %vm1155_vm3 = vmand %vm209_vm0, %vm218_vm1  ;;  %v1159_v8 = vstv %s235_s18  ;;  %vm1166_vm4 = vcmp.ge.s32.totalorder %v1142_v3, %v273_v6  ;;  %s382_s28 = sld [smem:[#allocation4 + %s1382_s1]]  ;;  %s713_s18 = sshll.u32 %s938_s12, 12 }
  0x78   : > { %v1161_v9 = vstv %s236_s21  ;;  %vm238_vm6 = vcmp.ge.s32.totalorder %v1129_v1, %v1159_v8  ;;  %vm1178_vm8 = vmand %vm210_vm2, %vm219_vm5  ;;  %vm239_vm0 = vcmp.ge.s32.totalorder %v1138_v2, %v1159_v8  ;;  %s410_s30 = sld [smem:[#allocation3 + %s409_s29]]  ;;  %s571_s21 = sshll.u32 %s1235_s26, 4  ;;  %s1913_s21 = int_to_ptr.vmem [resolvable:$true] %s571_s21 }
  0x79   : > { %vm247_vm7 = vcmp.lt.s32.totalorder %v1129_v1, %v1161_v9  ;;  %v276_v11 = vstv %s1133_s19  ;;  %vm248_vm1 = vcmp.lt.s32.totalorder %v1138_v2, %v1161_v9  ;;  %s411_s6 = sld [smem:[#allocation4 + %s409_s29]] }
  0x7a   : > { %v283_v12 = vstv %s1135_s20  ;;  %vm1182_vm9 = vmand %vm238_vm6, %vm247_vm7  ;;  %vm277_vm10 = vcmp.lt.s32.totalorder %v1142_v3, %v276_v11  ;;  %vm211_vm6 = vcmp.ge.s32.totalorder %v1203_v16, %v1144_v4  ;;  %vm220_vm7 = vcmp.lt.s32.totalorder %v1203_v16, %v1146_v5  ;;  %s1465_s7 = sld [smem:[#allocation5 + %s1382_s1]]  ;;  %s1903_s20 = scalar_lea.hbm %s1966_s5, %s713_s18 }
  0x7b   : > { %vm284_vm11 = vcmp.ge.s32.totalorder %v1142_v3, %v283_v12  ;;  %v286_v15 = vstv %s1140_s25  ;;  %vm1972_vm12 = vmor %vm1155_vm3, %vm1182_vm9  ;;  %s1468_s2 = sld [smem:[#allocation6 + %s1382_s1]]  ;;  %s862_s25 = scalar_lea.vmem %s1913_s21, 4096 }
  0x7c   : > { %vm287_vm13 = vcmp.lt.s32.totalorder %v1142_v3, %v286_v15  ;;  %vm279_vm14 = vmand %vm1166_vm4, %vm277_vm10  ;;  %s1472_s15 = sld [smem:[#allocation5 + %s409_s29]]  ;;  %v1497_v61 = vstv %s381_s8  ;;  %p863_p3 = scmp.ne.s32.totalorder %s1913_s21, %s862_s25 }
  0x7d   : > { %vm289_vm15 = vmand %vm284_vm11, %vm287_vm13  ;;  %vm240_vm11 = vcmp.ge.s32.totalorder %v1203_v16, %v1159_v8  ;;  %vm249_vm13 = vcmp.lt.s32.totalorder %v1203_v16, %v1161_v9  ;;  %s1474_s16 = sld [smem:[#allocation6 + %s409_s29]]  ;;  %v1499_v62 = vstv %s382_s28  ;;  %s866_s1 = sshll.u32 %s955_s0, 4  ;;  %s867_s1 = int_to_ptr.vmem [resolvable:$false] %s866_s1 }
  0x7e   : > { %vm1210_vm2 = vmor %vm279_vm14, %vm289_vm15  ;;  %p864_p12 = pnand %p863_p3, %p2121_p6  ;;  %s868_s29 = scalar_lea.vmem %s867_s1, 8192 }
  0x7f   : > { %vm313_vm4 = vmor %vm1972_vm12, %vm1210_vm2  ;;  %vm213_vm12 = vcmp.ge.s32.totalorder %v1268_v27, %v1144_v4  ;;  %v1521_v7 = vstv %s411_s6  ;;  %p869_p8 = scmp.lt.s32.totalorder %s1913_s21, %s867_s1  ;;  %p870_p11 = scmp.lt.s32.totalorder %s868_s29, %s862_s25 }
  0x80   : > { %v345_v19 = vsel %vm313_vm4, 0.0, %v329_v17  ;;  %vm1221_vm5 = vmand %vm239_vm0, %vm248_vm1  ;;  %vm212_vm1 = vcmp.ge.s32.totalorder %v1231_v22, %v1144_v4  ;;  %vm221_vm4 = vcmp.lt.s32.totalorder %v1231_v22, %v1146_v5  ;;  %p865_p5 = pneg %p864_p12 }
  0x81   : > { %361 = vst [vmem:[%s1235_s26] sm:$0xff] %v345_v19  ;;  %vm1971_vm10 = vmor %vm1178_vm8, %vm1221_vm5  ;;  %v451_v13 = vstv %s1468_s2  ;;  %p871_p10 = por %p870_p11, %p869_p8 }
  0x82   : > { %vm314_vm14 = vmor %vm1971_vm10, %vm1210_vm2 }
  0x83   : > { %v346_v23 = vsel %vm314_vm14, 0.0, %v330_v21  ;;  %vm1253_vm15 = vmand %vm211_vm6, %vm220_vm7  ;;  %vm241_vm7 = vcmp.ge.s32.totalorder %v1231_v22, %v1159_v8  ;;  %v461_v17 = vstv %s1474_s16  ;;  %p872_p13 = pnand %p871_p10, %p865_p5 }
  0x84   : > { %v2023_v24 = vsel %vm1253_vm15, 4294967295, %v2022_v24  ;;  %362 = vst [vmem:[%s1235_s26 + $0x8] sm:$0xff] %v346_v23  ;;  %vm1258_vm0 = vmand %vm240_vm11, %vm249_vm13  ;;  %vm250_vm11 = vcmp.lt.s32.totalorder %v1231_v22, %v1161_v9 }
  0x85   : > { %v2025_v25 = vsel %vm1258_vm0, 4294967295, %v2024_v25  ;;  %vm1973_vm6 = vmor %vm1253_vm15, %vm1258_vm0  ;;  %vm214_vm15 = vcmp.ge.s32.totalorder %v1301_v32, %v1144_v4 }
  0x86   : > { %vm315_vm13 = vmor %vm1973_vm6, %vm1210_vm2  ;;  %vm222_vm6 = vcmp.lt.s32.totalorder %v1268_v27, %v1146_v5 }
  0x87   : > { %v347_v28 = vsel %vm315_vm13, 0.0, %v331_v26  ;;  %vm1285_vm14 = vmand %vm212_vm1, %vm221_vm4  ;;  %vm242_vm4 = vcmp.ge.s32.totalorder %v1268_v27, %v1159_v8 }
  0x88   : > { %v2027_v29 = vsel %vm1285_vm14, 4294967295, %v2026_v29  ;;  %363 = vst [vmem:[%s1235_s26 + $0x10] sm:$0xff] %v347_v28  ;;  %vm1291_vm10 = vmand %vm241_vm7, %vm250_vm11  ;;  %vm251_vm7 = vcmp.lt.s32.totalorder %v1268_v27, %v1161_v9  ;;  %v2078_v28 = vmov 0 }
  0x89   : > { %v2029_v30 = vsel %vm1291_vm10, 4294967295, %v2028_v30  ;;  %vm1976_vm1 = vmor %vm1285_vm14, %vm1291_vm10  ;;  %vm215_vm14 = vcmp.ge.s32.totalorder %v1333_v37, %v1144_v4 }
  0x8a   : > { %vm316_vm11 = vmor %vm1976_vm1, %vm1210_vm2  ;;  %vm223_vm1 = vcmp.lt.s32.totalorder %v1301_v32, %v1146_v5 }
  0x8b   : > { %v348_v33 = vsel %vm316_vm11, 0.0, %v332_v31  ;;  %vm1318_vm13 = vmand %vm213_vm12, %vm222_vm6  ;;  %vm243_vm6 = vcmp.ge.s32.totalorder %v1301_v32, %v1159_v8  ;;  %v2082_v31 = vmov 0 }
  0x8c   : > { %364 = vst [vmem:[%s1235_s26 + $0x18] sm:$0xff] %v348_v33  ;;  %vm1323_vm0 = vmand %vm242_vm4, %vm251_vm7  ;;  %vm252_vm4 = vcmp.lt.s32.totalorder %v1301_v32, %v1161_v9  ;;  %v2084_v33 = vmov 0 }
  0x8d   : > { %v2033_v35 = vsel %vm1323_vm0, 4294967295, %v2032_v35  ;;  %vm1979_vm12 = vmor %vm1318_vm13, %vm1323_vm0 }
  0x8e   : > { %vm317_vm7 = vmor %vm1979_vm12, %vm1210_vm2  ;;  %vm224_vm12 = vcmp.lt.s32.totalorder %v1333_v37, %v1146_v5 }
  0x8f   : > { %v349_v38 = vsel %vm317_vm7, 0.0, %v333_v36  ;;  %vm1350_vm11 = vmand %vm214_vm15, %vm223_vm1  ;;  %vm244_vm1 = vcmp.ge.s32.totalorder %v1333_v37, %v1159_v8  ;;  %v2088_v36 = vmov 0 }
  0x90   : > { %v2035_v39 = vsel %vm1350_vm11, 4294967295, %v2034_v39  ;;  %365 = vst [vmem:[%s1235_s26 + $0x20] sm:$0xff] %v349_v38  ;;  %vm1355_vm10 = vmand %vm243_vm6, %vm252_vm4  ;;  %vm253_vm6 = vcmp.lt.s32.totalorder %v1333_v37, %v1161_v9 }
  0x91   : > { %v2037_v40 = vsel %vm1355_vm10, 4294967295, %v2036_v40  ;;  %vm1981_vm15 = vmor %vm1350_vm11, %vm1355_vm10 }
  0x92   : > { %vm318_vm4 = vmor %vm1981_vm15, %vm1210_vm2  ;;  %vm216_vm15 = vcmp.ge.s32.totalorder %v1365_v42, %v1144_v4  ;;  %v1510_v4 = vstv %s410_s30 }
  0x93   : > { %v350_v43 = vsel %vm318_vm4, 0.0, %v334_v41  ;;  %vm1384_vm7 = vmand %vm215_vm14, %vm224_vm12  ;;  %vm225_vm4 = vcmp.lt.s32.totalorder %v1365_v42, %v1146_v5  ;;  %vm245_vm12 = vcmp.ge.s32.totalorder %v1365_v42, %v1159_v8 }
  0x94   : > { %v2039_v44 = vsel %vm1384_vm7, 4294967295, %v2038_v44  ;;  %366 = vst [vmem:[%s1235_s26 + $0x28] sm:$0xff] %v350_v43  ;;  %vm1389_vm0 = vmand %vm244_vm1, %vm253_vm6  ;;  %vm254_vm1 = vcmp.lt.s32.totalorder %v1365_v42, %v1161_v9  ;;  %v343_v9 = vld [vmem:[%s1118_s9 + $0x70] sm:$0xff]  ;;  %v2094_v43 = vmov 0 }
  0x95   : > { %v2041_v45 = vsel %vm1389_vm0, 4294967295, %v2040_v45  ;;  %vm1984_vm14 = vmor %vm1384_vm7, %vm1389_vm0 }
  0x96   : > { %vm319_vm6 = vmor %vm1984_vm14, %vm1210_vm2  ;;  %vm1432_vm14 = vcmp.ge.s32.totalorder %v1399_v47, %v273_v6  ;;  %v342_v6 = vld [vmem:[%s1118_s9 + $0x68] sm:$0xff] }
  0x97   : > { %v351_v48 = vsel %vm319_vm6, 0.0, %v335_v46  ;;  %vm1417_vm10 = vmand %vm216_vm15, %vm225_vm4  ;;  %vm1439_vm15 = vcmp.lt.s32.totalorder %v1399_v47, %v276_v11  ;;  %v344_v11 = vld [vmem:[%s1118_s9 + $0x78] sm:$0xff] }
  0x98   : > { %367 = vst [vmem:[%s1235_s26 + $0x30] sm:$0xff] %v351_v48  ;;  %vm1424_vm11 = vmand %vm245_vm12, %vm254_vm1  ;;  %vm285_vm12 = vcmp.ge.s32.totalorder %v1399_v47, %v283_v12  ;;  %vm288_vm1 = vcmp.lt.s32.totalorder %v1399_v47, %v286_v15  ;;  %v448_v12 = vstv %s1465_s7  ;;  %v458_v15 = vstv %s1472_s15 }
  0x99   : > { %vm270_vm4 = vmor %vm1417_vm10, %vm1424_vm11  ;;  %vm459_vm11 = vcmp.ge.s32.totalorder %v1142_v3, %v458_v15 }
  0x9a   : > { %vm320_vm6 = vmor %vm270_vm4, %vm1210_vm2 }
  0x9b   : > { %v352_v54 = vsel %vm320_vm6, 0.0, %v336_v51  ;;  %vm280_vm0 = vmand %vm1432_vm14, %vm1439_vm15 }
  0x9c   : > { %368 = vst [vmem:[%s1235_s26 + $0x38] sm:$0xff] %v352_v54  ;;  %vm290_vm7 = vmand %vm285_vm12, %vm288_vm1  ;;  %v683_v54 = vld [vmem:[%s1118_s9 + $0xd8] sm:$0xff] }
  0x9d   : > { %vm1476_vm2 = vmor %vm280_vm0, %vm290_vm7 }
  0x9e   : > { %vm2052_vm14 = vmor %vm1155_vm3, %vm1182_vm9  ;;  %vm2054_vm3 = vnez %v2023_v24  ;;  %vm2055_vm9 = vnez %v2025_v25  ;;  %v2076_v25 = vmov 0 }
  0x9f   : > { %vm321_vm15 = vmor %vm2052_vm14, %vm1476_vm2 }
  0xa0   : > { %v353_v59 = vsel %vm321_vm15, 0.0, %v337_v55  ;;  %vm2053_vm0 = vmor %vm1178_vm8, %vm1221_vm5  ;;  %vm2057_vm8 = vnez %v2027_v29  ;;  %vm2058_vm5 = vnez %v2029_v30  ;;  %vm2060_vm15 = vnez %v2033_v35 }
  0xa1   : > { %vm322_vm7 = vmor %vm2053_vm0, %vm1476_vm2  ;;  %369 = vst [vmem:[%s1235_s26 + $0x40] sm:$0xff] %v353_v59  ;;  %v2080_v29 = vmov 0 }
  0xa2   : > { %v354_v63 = vsel %vm322_vm7, 0.0, %v338_v57  ;;  %vm2056_vm12 = vmor %vm2054_vm3, %vm2055_vm9  ;;  %vm384_vm3 = vcmp.ge.s32.totalorder %v1129_v1, %v1497_v61  ;;  %vm393_vm9 = vcmp.lt.s32.totalorder %v1129_v1, %v1499_v62 }
  0xa3   : > { %vm323_vm1 = vmor %vm2056_vm12, %vm1476_vm2  ;;  %370 = vst [vmem:[%s1235_s26 + $0x48] sm:$0xff] %v354_v63  ;;  %vm2062_vm12 = vnez %v2035_v39  ;;  %v2090_v39 = vmov 0 }
  0xa4   : > { %v355_v5 = vsel %vm323_vm1, 0.0, %v339_v58  ;;  %vm2059_vm6 = vmor %vm2057_vm8, %vm2058_vm5  ;;  %vm413_vm5 = vcmp.ge.s32.totalorder %v1129_v1, %v1510_v4  ;;  %v685_v58 = vld [vmem:[%s1118_s9 + $0xe8] sm:$0xff] }
  0xa5   : > { %vm324_vm14 = vmor %vm2059_vm6, %vm1476_vm2  ;;  %371 = vst [vmem:[%s1235_s26 + $0x50] sm:$0xff] %v355_v5  ;;  %vm2065_vm6 = vnez %v2039_v44  ;;  %v2096_v44 = vmov 0 }
  0xa6   : > { %v356_v8 = vsel %vm324_vm14, 0.0, %v340_v60  ;;  %vm2061_vm0 = vmor %vm1318_vm13, %vm2060_vm15  ;;  %vm2063_vm13 = vnez %v2037_v40  ;;  %vm2066_vm14 = vnez %v2041_v45  ;;  %v2092_v40 = vmov 0  ;;  %v686_v60 = vld [vmem:[%s1118_s9 + $0xf0] sm:$0xff] }
  0xa7   : > { %vm325_vm7 = vmor %vm2061_vm0, %vm1476_vm2  ;;  %372 = vst [vmem:[%s1235_s26 + $0x58] sm:$0xff] %v356_v8 }
  0xa8   : > { %v357_v10 = vsel %vm325_vm7, 0.0, %v341_v0  ;;  %vm2064_vm1 = vmor %vm2062_vm12, %vm2063_vm13  ;;  %vm422_vm7 = vcmp.lt.s32.totalorder %v1129_v1, %v1521_v7  ;;  %v672_v1 = vld [vmem:[%s1118_s9 + $0x80] sm:$0xff] }
  0xa9   : > { %vm326_vm8 = vmor %vm2064_vm1, %vm1476_vm2  ;;  %373 = vst [vmem:[%s1235_s26 + $0x60] sm:$0xff] %v357_v10  ;;  %vm449_vm1 = vcmp.ge.s32.totalorder %v1142_v3, %v448_v12 }
  0xaa   : > { %v358_v14 = vsel %vm326_vm8, 0.0, %v342_v6  ;;  %vm2067_vm15 = vmor %vm2065_vm6, %vm2066_vm14  ;;  %vm452_vm8 = vcmp.lt.s32.totalorder %v1142_v3, %v451_v13  ;;  %vm394_vm6 = vcmp.lt.s32.totalorder %v1138_v2, %v1499_v62 }
  0xab   : > { %vm327_vm0 = vmor %vm2067_vm15, %vm1476_vm2  ;;  %374 = vst [vmem:[%s1235_s26 + $0x68] sm:$0xff] %v358_v14  ;;  %vm414_vm15 = vcmp.ge.s32.totalorder %v1138_v2, %v1510_v4 }
  0xac   : > { %v359_v18 = vsel %vm327_vm0, 0.0, %v343_v9  ;;  %vm328_vm12 = vmor %vm270_vm4, %vm1476_vm2  ;;  %vm462_vm4 = vcmp.lt.s32.totalorder %v1142_v3, %v461_v17  ;;  %vm423_vm0 = vcmp.lt.s32.totalorder %v1138_v2, %v1521_v7 }
  0xad   : > { %375 = vst [vmem:[%s1235_s26 + $0x70] sm:$0xff] %v359_v18  ;;  %v360_v19 = vsel %vm328_vm12, 0.0, %v344_v11  ;;  %vm1576_vm13 = vmand %vm384_vm3, %vm393_vm9 }
  0xae   : > { %376 = vst [vmem:[%s1235_s26 + $0x78] sm:$0xff] %v360_v19  ;;  %vm1590_vm10 = vmand %vm413_vm5, %vm422_vm7  ;;  %vm385_vm5 = vcmp.ge.s32.totalorder %v1138_v2, %v1497_v61  ;;  %v673_v2 = vld [vmem:[%s1118_s9 + $0x88] sm:$0xff] }
  0xaf   : > { %vm1988_vm2 = vmor %vm1576_vm13, %vm1590_vm10 }
  0xb0   : > { %vm454_vm3 = vmand %vm449_vm1, %vm452_vm8  ;;  %vm386_vm8 = vcmp.ge.s32.totalorder %v1203_v16, %v1497_v61 }
  0xb1   : > { %vm464_vm9 = vmand %vm459_vm11, %vm462_vm4  ;;  %vm395_vm11 = vcmp.lt.s32.totalorder %v1203_v16, %v1499_v62 }
  0xb2   : > { %vm1609_vm14 = vmor %vm454_vm3, %vm464_vm9  ;;  %vm415_vm3 = vcmp.ge.s32.totalorder %v1203_v16, %v1510_v4  ;;  %vm424_vm9 = vcmp.lt.s32.totalorder %v1203_v16, %v1521_v7  ;;  %v674_v16 = vld [vmem:[%s1118_s9 + $0x90] sm:$0xff] }
  0xb3   : > { %vm488_vm7 = vmor %vm1988_vm2, %vm1609_vm14  ;;  %vm388_vm2 = vcmp.ge.s32.totalorder %v1268_v27, %v1497_v61 }
  0xb4   : > { %v521_v3 = vsel %vm488_vm7, 0.0, %v672_v1  ;;  %vm1624_vm12 = vmand %vm385_vm5, %vm394_vm6  ;;  %vm396_vm7 = vcmp.lt.s32.totalorder %v1231_v22, %v1499_v62 }
  0xb5   : > { %688 = vst [vmem:[%s1235_s26 + $0x80] sm:$0xff] %v521_v3  ;;  %vm1629_vm1 = vmand %vm414_vm15, %vm423_vm0  ;;  %vm387_vm0 = vcmp.ge.s32.totalorder %v1231_v22, %v1497_v61 }
  0xb6   : > { %v2077_v25 = vsel %vm1629_vm1, 4294967295, %v2076_v25  ;;  %vm1987_vm4 = vmor %vm1624_vm12, %vm1629_vm1  ;;  %vm397_vm1 = vcmp.lt.s32.totalorder %v1268_v27, %v1499_v62 }
  0xb7   : > { %vm489_vm5 = vmor %vm1987_vm4, %vm1609_vm14 }
  0xb8   : > { %v522_v26 = vsel %vm489_vm5, 0.0, %v673_v2  ;;  %vm1653_vm6 = vmand %vm386_vm8, %vm395_vm11  ;;  %vm416_vm11 = vcmp.ge.s32.totalorder %v1231_v22, %v1510_v4 }
  0xb9   : > { %v2079_v28 = vsel %vm1653_vm6, 4294967295, %v2078_v28  ;;  %689 = vst [vmem:[%s1235_s26 + $0x88] sm:$0xff] %v522_v26  ;;  %vm1658_vm15 = vmand %vm415_vm3, %vm424_vm9  ;;  %vm425_vm3 = vcmp.lt.s32.totalorder %v1231_v22, %v1521_v7  ;;  %v675_v22 = vld [vmem:[%s1118_s9 + $0x98] sm:$0xff] }
  0xba   : > { %v2081_v29 = vsel %vm1658_vm15, 4294967295, %v2080_v29  ;;  %vm1990_vm8 = vmor %vm1653_vm6, %vm1658_vm15  ;;  %vm389_vm15 = vcmp.ge.s32.totalorder %v1301_v32, %v1497_v61  ;;  %vm398_vm6 = vcmp.lt.s32.totalorder %v1301_v32, %v1499_v62 }
  0xbb   : > { %vm490_vm9 = vmor %vm1990_vm8, %vm1609_vm14 }
  0xbc   : > { %v523_v30 = vsel %vm490_vm9, 0.0, %v674_v16  ;;  %vm1682_vm5 = vmand %vm387_vm0, %vm396_vm7  ;;  %vm417_vm7 = vcmp.ge.s32.totalorder %v1268_v27, %v1510_v4 }
  0xbd   : > { %v2083_v31 = vsel %vm1682_vm5, 4294967295, %v2082_v31  ;;  %690 = vst [vmem:[%s1235_s26 + $0x90] sm:$0xff] %v523_v30  ;;  %vm1687_vm4 = vmand %vm416_vm11, %vm425_vm3  ;;  %vm426_vm11 = vcmp.lt.s32.totalorder %v1268_v27, %v1521_v7  ;;  %v676_v27 = vld [vmem:[%s1118_s9 + $0xa0] sm:$0xff] }
  0xbe   : > { %v2085_v33 = vsel %vm1687_vm4, 4294967295, %v2084_v33  ;;  %vm1993_vm0 = vmor %vm1682_vm5, %vm1687_vm4  ;;  %vm390_vm4 = vcmp.ge.s32.totalorder %v1333_v37, %v1497_v61  ;;  %vm399_vm5 = vcmp.lt.s32.totalorder %v1333_v37, %v1499_v62 }
  0xbf   : > { %vm491_vm3 = vmor %vm1993_vm0, %vm1609_vm14 }
  0xc0   : > { %v524_v34 = vsel %vm491_vm3, 0.0, %v675_v22  ;;  %vm1711_vm9 = vmand %vm388_vm2, %vm397_vm1  ;;  %vm418_vm1 = vcmp.ge.s32.totalorder %v1301_v32, %v1510_v4 }
  0xc1   : > { %691 = vst [vmem:[%s1235_s26 + $0x98] sm:$0xff] %v524_v34  ;;  %vm1716_vm8 = vmand %vm417_vm7, %vm426_vm11  ;;  %vm427_vm7 = vcmp.lt.s32.totalorder %v1301_v32, %v1521_v7  ;;  %v677_v32 = vld [vmem:[%s1118_s9 + $0xa8] sm:$0xff] }
  0xc2   : > { %v2089_v36 = vsel %vm1716_vm8, 4294967295, %v2088_v36  ;;  %vm1996_vm2 = vmor %vm1711_vm9, %vm1716_vm8  ;;  %vm450_vm8 = vcmp.ge.s32.totalorder %v1399_v47, %v448_v12 }
  0xc3   : > { %vm492_vm11 = vmor %vm1996_vm2, %vm1609_vm14 }
  0xc4   : > { %v525_v38 = vsel %vm492_vm11, 0.0, %v676_v27  ;;  %vm1740_vm3 = vmand %vm389_vm15, %vm398_vm6  ;;  %vm419_vm15 = vcmp.ge.s32.totalorder %v1333_v37, %v1510_v4 }
  0xc5   : > { %v2091_v39 = vsel %vm1740_vm3, 4294967295, %v2090_v39  ;;  %692 = vst [vmem:[%s1235_s26 + $0xa0] sm:$0xff] %v525_v38  ;;  %vm1745_vm0 = vmand %vm418_vm1, %vm427_vm7  ;;  %vm428_vm1 = vcmp.lt.s32.totalorder %v1333_v37, %v1521_v7  ;;  %v678_v37 = vld [vmem:[%s1118_s9 + $0xb0] sm:$0xff] }
  0xc6   : > { %v2093_v40 = vsel %vm1745_vm0, 4294967295, %v2092_v40  ;;  %vm1998_vm6 = vmor %vm1740_vm3, %vm1745_vm0  ;;  %vm391_vm0 = vcmp.ge.s32.totalorder %v1365_v42, %v1497_v61 }
  0xc7   : > { %vm493_vm7 = vmor %vm1998_vm6, %vm1609_vm14 }
  0xc8   : > { %v526_v41 = vsel %vm493_vm7, 0.0, %v677_v32  ;;  %vm1769_vm11 = vmand %vm390_vm4, %vm399_vm5  ;;  %vm400_vm7 = vcmp.lt.s32.totalorder %v1365_v42, %v1499_v62  ;;  %vm420_vm5 = vcmp.ge.s32.totalorder %v1365_v42, %v1510_v4  ;;  %v687_v62 = vld [vmem:[%s1118_s9 + $0xf8] sm:$0xff] }
  0xc9   : > { %v2095_v43 = vsel %vm1769_vm11, 4294967295, %v2094_v43  ;;  %693 = vst [vmem:[%s1235_s26 + $0xa8] sm:$0xff] %v526_v41  ;;  %vm1774_vm2 = vmand %vm419_vm15, %vm428_vm1  ;;  %vm429_vm15 = vcmp.lt.s32.totalorder %v1365_v42, %v1521_v7  ;;  %v679_v42 = vld [vmem:[%s1118_s9 + $0xb8] sm:$0xff] }
  0xca   : > { %v2097_v44 = vsel %vm1774_vm2, 4294967295, %v2096_v44  ;;  %vm2001_vm4 = vmor %vm1769_vm11, %vm1774_vm2 }
  0xcb   : > { %vm494_vm1 = vmor %vm2001_vm4, %vm1609_vm14  ;;  %vm453_vm4 = vcmp.lt.s32.totalorder %v1399_v47, %v451_v13 }
  0xcc   : > { %v527_v45 = vsel %vm494_vm1, 0.0, %v678_v37  ;;  %vm1798_vm6 = vmand %vm391_vm0, %vm400_vm7  ;;  %vm460_vm7 = vcmp.ge.s32.totalorder %v1399_v47, %v458_v15 }
  0xcd   : > { %694 = vst [vmem:[%s1235_s26 + $0xb0] sm:$0xff] %v527_v45  ;;  %vm1803_vm3 = vmand %vm420_vm5, %vm429_vm15  ;;  %vm463_vm5 = vcmp.lt.s32.totalorder %v1399_v47, %v461_v17  ;;  %v681_v47 = vld [vmem:[%s1118_s9 + $0xc8] sm:$0xff]  ;;  %s555_s9 = scalar_lea.sflag [#allocation9], %s1112_s27 }
  0xce   : > { %vm445_vm0 = vmor %vm1798_vm6, %vm1803_vm3 }
  0xcf   : > { %vm495_vm15 = vmor %vm445_vm0, %vm1609_vm14 }
  0xd0   : > { %v528_v49 = vsel %vm495_vm15, 0.0, %v679_v42  ;;  %vm455_vm1 = vmand %vm450_vm8, %vm453_vm4  ;;  %vm2105_vm8 = vnez %v2077_v25 }
  0xd1   : > { %695 = vst [vmem:[%s1235_s26 + $0xb8] sm:$0xff] %v528_v49  ;;  %vm465_vm2 = vmand %vm460_vm7, %vm463_vm5 }
  0xd2   : > { %vm1833_vm11 = vmor %vm455_vm1, %vm465_vm2  ;;  %vm2111_vm1 = vnez %v2085_v33 }
  0xd3   : > { %vm2104_vm14 = vmor %vm1576_vm13, %vm1590_vm10  ;;  %vm2107_vm13 = vnez %v2079_v28  ;;  %vm2108_vm10 = vnez %v2081_v29 }
  0xd4   : > { %vm496_vm15 = vmor %vm2104_vm14, %vm1833_vm11 }
  0xd5   : > { %v529_v53 = vsel %vm496_vm15, 0.0, %v680_v50  ;;  %vm2106_vm2 = vmor %vm1624_vm12, %vm2105_vm8  ;;  %vm2110_vm12 = vnez %v2083_v31  ;;  %vm2113_vm8 = vnez %v2089_v36 }
  0xd6   : > { %vm497_vm4 = vmor %vm2106_vm2, %vm1833_vm11  ;;  %696 = vst [vmem:[%s1235_s26 + $0xc0] sm:$0xff] %v529_v53 }
  0xd7   : > { %v530_v55 = vsel %vm497_vm4, 0.0, %v681_v47  ;;  %vm2109_vm7 = vmor %vm2107_vm13, %vm2108_vm10  ;;  %vm2115_vm13 = vnez %v2091_v39  ;;  %vm2116_vm10 = vnez %v2093_v40 }
  0xd8   : > { %vm498_vm5 = vmor %vm2109_vm7, %vm1833_vm11  ;;  %697 = vst [vmem:[%s1235_s26 + $0xc8] sm:$0xff] %v530_v55 }
  0xd9   : > { %v531_v57 = vsel %vm498_vm5, 0.0, %v682_v52  ;;  %vm2112_vm14 = vmor %vm2110_vm12, %vm2111_vm1  ;;  %vm2119_vm12 = vnez %v2097_v44 }
  0xda   : > { %vm499_vm15 = vmor %vm2112_vm14, %vm1833_vm11  ;;  %698 = vst [vmem:[%s1235_s26 + $0xd0] sm:$0xff] %v531_v57 }
  0xdb   : > { %v532_v59 = vsel %vm499_vm15, 0.0, %v683_v54  ;;  %vm2114_vm2 = vmor %vm1711_vm9, %vm2113_vm8  ;;  %vm2118_vm9 = vnez %v2095_v43 }
  0xdc   : > { %vm500_vm4 = vmor %vm2114_vm2, %vm1833_vm11  ;;  %699 = vst [vmem:[%s1235_s26 + $0xd8] sm:$0xff] %v532_v59 }
  0xdd   : > { %v533_v61 = vsel %vm500_vm4, 0.0, %v684_v56  ;;  %vm2117_vm7 = vmor %vm2115_vm13, %vm2116_vm10 }
  0xde   : > { %vm501_vm5 = vmor %vm2117_vm7, %vm1833_vm11  ;;  %700 = vst [vmem:[%s1235_s26 + $0xe0] sm:$0xff] %v533_v61 }
  0xdf   : > { %v534_v63 = vsel %vm501_vm5, 0.0, %v685_v58  ;;  %vm2120_vm1 = vmor %vm2118_vm9, %vm2119_vm12 }
  0xe0   : > { %vm502_vm14 = vmor %vm2120_vm1, %vm1833_vm11  ;;  %701 = vst [vmem:[%s1235_s26 + $0xe8] sm:$0xff] %v534_v63 }
  0xe1   : > { %v535_v0 = vsel %vm502_vm14, 0.0, %v686_v60  ;;  %vm503_vm15 = vmor %vm445_vm0, %vm1833_vm11 }
  0xe2   : > { %702 = vst [vmem:[%s1235_s26 + $0xf0] sm:$0xff] %v535_v0  ;;  %v536_v4 = vsel %vm503_vm15, 0.0, %v687_v62 }
  0xe3   : > { %703 = vst [vmem:[%s1235_s26 + $0xf8] sm:$0xff] %v536_v4 }
  0xe4   : > { %875 = shalt.err (!%p872_p13)
}
  0xe5   : > { %s876_s26 = scalar_lea.hbm %s1903_s20, 4096  ;;  %s880_s30 = scalar_lea.hbm %s1966_s5, 8192 }
  0xe6   : > { %p877_p2 = scmp.ne.s32.totalorder %s1903_s20, %s876_s26  ;;  %p881_p9 = scmp.lt.u32.totalorder %s1903_s20, %s1966_s5 }
  0xe7   : > { %p882_p1 = scmp.lt.u32.totalorder %s880_s30, %s876_s26  ;;  %p884_p3 = scmp.lt.u32.totalorder %s876_s26, %s1903_s20 }
  0xe8   : > { %p878_p4 = pnand %p877_p2, %p2121_p6 }
  0xe9   : > { %p883_p0 = por %p882_p1, %p881_p9 }
  0xea   : > { %p879_p7 = pneg %p878_p4 }
  0xeb   : > { %p885_p12 = por %p884_p3, %p883_p0 }
  0xed   : > { %p886_p5 = pnand %p885_p12, %p879_p7 }
  0xef   : > { %889 = shalt.err (!%p886_p5)
}
  0xf0   : > { %s956_s2 = smov 1024   ;;  %s957_s15 = smov 64  }
  0xf1   : > { %716 = dma.vmem_to_hbm [thread:$0]  (%p2121_p6), %s1913_s21, 4096, %s1903_s20, %s555_s9, %s956_s2, %s956_s2, %s957_s15  }
  0xf2 PF: > { %s586_s16 = sand.u32 1, %s926_s3   ;;  %p2122_p8 = scmp.ne.s32.totalorder %s2007_s24, 0 }
  0xf3   : > { %p2123_p11 = scmp.ge.s32.totalorder %s946_s14, 2  ;;  %s587_s18 = scalar_lea.sflag [#allocation9], %s586_s16 }
  0xf5   : > { %p723_p10 = pnand %p2123_p11, %p2122_p8 }
  0xf7   : > { %921 = dma.done.wait (!%p723_p10), %s587_s18, 4096  }
  0xf8   : > { %923 = vsyncadd (!%p723_p10), %s587_s18, 4294963200  ;;  %s39_s14 = sadd.s32 1, %s946_s14   ;;  %s2124_s3 = smov %s930_s10 }
  0xf9   : > { %p36_p13 = scmp.ge.s32.totalorder %s39_s14, 4   ;;  %s2125_s10 = smov %s934_s11 }
  0xfa   : > { %s2126_s11 = smov %s1056_s23  ;;  %s2127_s12 = smov %s942_s13 }
  0xfb   : > { %s2128_s13 = smov %s2130_s17  ;;  %38 = sbr.rel (!%p36_p13) target bundleno = 52 (0x34), region = 71 }
 0x102   :  { %592 = vsyncpa [#allocation8], 1 }
 0x103   :  { %594 = vsyncpa [#allocation8 + $0x1], 1 }
 0x104   :  { %595 = vsyncpa [#allocation9], 1 }
 0x105   :  { %597 = vsyncpa [#allocation9 + $0x1], 1 }

</bundles_post_ra>
